<compile_context>
chip_gen: v7x
topology: tpu7x:2x2x1
jax: 0.10.0
libtpu: 0.0.40
codegen_flags: <defaults>
</compile_context>

<pallas_src>
import math
import numpy as np
import jax
import jax.numpy as jnp
from jax.experimental import pallas as pl
from jax.experimental.pallas import tpu as pltpu


# ---------------------------------------------------------------------------
# Pallas kernel:  o[m, n] = sum_k x[m, k] * w[k, n] + b[n]
#   x tile   : (tm, K)   streamed over the M grid axis
#   w block  : (K, N)    full weight, VMEM-resident across the whole grid
#   b block  : (1, N)    full bias,  VMEM-resident across the whole grid
# ---------------------------------------------------------------------------
def _linear_kernel(x_ref, w_ref, b_ref, o_ref):
    acc = jnp.dot(x_ref[...], w_ref[...], preferred_element_type=jnp.float32)
    o_ref[...] = (acc + b_ref[...].astype(jnp.float32)).astype(o_ref.dtype)


def _round_up(x, m):
    return ((x + m - 1) // m) * m


def linear_forward(x, w_kn, b_row, *, tm_max=1024):
    """x: (M, K), w_kn: (K, N) (= torch weight transposed), b_row: (1, N) -> (M, N)."""
    M, K = x.shape
    K2, N = w_kn.shape
    assert K == K2 and b_row.shape == (1, N)

    # --- choose M tiling -----------------------------------------------------
    Mp8 = _round_up(max(M, 1), 8)          # minimum 8-row alignment
    n_blocks = pl.cdiv(Mp8, tm_max)
    if n_blocks == 1 and Mp8 >= 512:
        # v7x has 2 TensorCores: give the "parallel" M axis >= 2 blocks so
        # both cores get work for medium/large M.
        n_blocks = 2
    tm = _round_up(pl.cdiv(Mp8, n_blocks), 8)
    Mp = n_blocks * tm                     # padded row count (waste < 8*n_blocks rows)

    # Only pad when needed; zero rows are sliced off after the call.
    x_p = x if Mp == M else jnp.pad(x, ((0, Mp - M), (0, 0)))

    grid = (n_blocks,)

    out = pl.pallas_call(
        _linear_kernel,
        out_shape=jax.ShapeDtypeStruct((Mp, N), x.dtype),
        grid_spec=pltpu.PrefetchScalarGridSpec(
            num_scalar_prefetch=0,
            grid=grid,
            in_specs=[
                pl.BlockSpec((tm, K), lambda i: (i, 0)),   # x tile (streamed)
                pl.BlockSpec((K, N), lambda i: (0, 0)),    # full weight (resident)
                pl.BlockSpec((1, N), lambda i: (0, 0)),    # full bias (resident)
            ],
            out_specs=pl.BlockSpec((tm, N), lambda i: (i, 0)),
        ),
        compiler_params=pltpu.CompilerParams(
            dimension_semantics=("parallel",),
        ),
    )(x_p, w_kn, b_row)

    return out if Mp == M else out[:M, :]


# ---------------------------------------------------------------------------
# Module equivalent of node_prompt_layer_linear_sum
# ---------------------------------------------------------------------------
# Problems with fewer MACs than this go straight to jnp: fixed pallas_call /
# pad / slice overhead dominates at sub-microsecond sizes.
_TINY_MAC_THRESHOLD = 1 << 15


class NodePromptLayerLinearSum:
    def __init__(self, input_dim, output_dim, key):
        # torch.nn.Linear default init: U(-1/sqrt(in), 1/sqrt(in)) for W and b.
        kw, kb = jax.random.split(key)
        bound = 1.0 / math.sqrt(input_dim)
        weight = jax.random.uniform(
            kw, (output_dim, input_dim), minval=-bound, maxval=bound,
            dtype=jnp.float32,
        )
        bias = jax.random.uniform(
            kb, (output_dim,), minval=-bound, maxval=bound, dtype=jnp.float32,
        )
        # Pre-transpose / pre-reshape ONCE so forward does no per-call
        # transpose or pad of the parameters.
        self.weight_kn = jnp.transpose(weight, (1, 0))   # (K, N)
        self.bias_row = bias.reshape(1, output_dim)      # (1, N)

    def __call__(self, graph_embedding, graph_len=None):
        # graph_len is part of the PyTorch forward signature but unused.
        M, K = graph_embedding.shape
        N = self.weight_kn.shape[1]
        if M * K * N < _TINY_MAC_THRESHOLD:
            # Tiny-problem fast path: let XLA fuse it; Pallas overhead loses.
            return graph_embedding @ self.weight_kn + self.bias_row
        return linear_forward(graph_embedding, self.weight_kn, self.bias_row)


# ---------------------------------------------------------------------------
if __name__ == "__main__":
    key = jax.random.PRNGKey(0)
    k_w, k_x1, k_x2 = jax.random.split(key, 3)

    input_dim = 32      # hidden dim of incoming node embeddings
    output_dim = 32     # linear output dim

    layer = NodePromptLayerLinearSum(input_dim, output_dim, k_w)

    # Case A: medium batch of nodes, not 8-aligned -> exercises the Pallas
    # kernel (pad-to-8 + slice path).
    graph_len_a = np.array([100, 170], dtype=np.int32)   # 2 ragged graphs
    total_nodes_a = int(graph_len_a.sum())               # 270
    x_a = jax.random.normal(k_x1, (total_nodes_a, input_dim), dtype=jnp.float32)

    out_a = layer(x_a, graph_len_a)
    out_a = jax.block_until_ready(out_a)
    ref_a = x_a @ layer.weight_kn + layer.bias_row
    np.testing.assert_allclose(np.asarray(out_a), np.asarray(ref_a),
                               rtol=1e-5, atol=1e-5)

    # Also run the Pallas path directly (bypassing the tiny-problem fallback)
    # on a small, non-aligned shape to verify padding/slicing correctness.
    graph_len_b = np.array([6, 8], dtype=np.int32)
    total_nodes_b = int(graph_len_b.sum())                # 14
    x_b = jax.random.normal(k_x2, (total_nodes_b, input_dim), dtype=jnp.float32)

    out_b = linear_forward(x_b, layer.weight_kn, layer.bias_row)
    out_b = jax.block_until_ready(out_b)
    ref_b = x_b @ layer.weight_kn + layer.bias_row
    np.testing.assert_allclose(np.asarray(out_b), np.asarray(ref_b),
                               rtol=1e-5, atol=1e-5)

    # Case C: the module's tiny-problem jnp fallback path.
    out_c = layer(x_b, graph_len_b)
    out_c = jax.block_until_ready(out_c)
    np.testing.assert_allclose(np.asarray(out_c), np.asarray(ref_b),
                               rtol=1e-5, atol=1e-5)

    print("KERNEL_OK")
</pallas_src>

<mosaic_0001>
module attributes {stable_mosaic.version = 11 : i64} {
  func.func @_linear_kernel(%arg0: i32, %arg1: memref<272x32xf32, #tpu.memory_space<vmem>>, %arg2: memref<32x32xf32, #tpu.memory_space<vmem>>, %arg3: memref<1x32xf32, #tpu.memory_space<vmem>>, %arg4: memref<272x32xf32, #tpu.memory_space<vmem>>) attributes {dimension_semantics = [#tpu.dimension_semantics<parallel>], iteration_bounds = array<i64: 1>, scalar_prefetch = 0 : i64, scratch_operands = 0 : i64, tpu.core_type = #tpu.core_type<tc>, window_params = [{transform_indices = @transform_0, window_bounds = array<i64: 272, 32>}, {pipeline_mode = #tpu.pipeline_mode<synchronous>, transform_indices = @transform_1, window_bounds = array<i64: 32, 32>}, {pipeline_mode = #tpu.pipeline_mode<synchronous>, transform_indices = @transform_2, window_bounds = array<i64: 1, 32>}, {transform_indices = @transform_3, window_bounds = array<i64: 272, 32>}]} {
    %c0 = arith.constant 0 : index
    %c0_0 = arith.constant 0 : index
    %0 = vector.load %arg1[%c0, %c0_0] : memref<272x32xf32, #tpu.memory_space<vmem>>, vector<272x32xf32>
    %c0_1 = arith.constant 0 : index
    %c0_2 = arith.constant 0 : index
    %1 = vector.load %arg2[%c0_1, %c0_2] : memref<32x32xf32, #tpu.memory_space<vmem>>, vector<32x32xf32>
    %cst = arith.constant dense<0.000000e+00> : vector<272x32xf32>
    %2 = tpu.matmul %0, %1, %cst {dimension_numbers = #tpu.dot_dimension_numbers<[1], [0], [0], [1], [0, 0, 1, 1], [], []>} : vector<272x32xf32>, vector<32x32xf32>, vector<272x32xf32> -> vector<272x32xf32>
    %c0_3 = arith.constant 0 : index
    %c0_4 = arith.constant 0 : index
    %3 = vector.load %arg3[%c0_3, %c0_4] : memref<1x32xf32, #tpu.memory_space<vmem>>, vector<1x32xf32>
    %4 = vector.broadcast %3 : vector<1x32xf32> to vector<272x32xf32>
    %5 = arith.addf %2, %4 : vector<272x32xf32>
    %c0_5 = arith.constant 0 : index
    %c0_6 = arith.constant 0 : index
    %6 = vector.load %arg4[%c0_5, %c0_6] : memref<272x32xf32, #tpu.memory_space<vmem>>, vector<272x32xf32>
    tpu.vector_store %arg4[%c0_5, %c0_6], %5 {strides = array<i32>} : memref<272x32xf32, #tpu.memory_space<vmem>>, vector<272x32xf32>,
    return
  }
  func.func @transform_0(%arg0: i32) -> (i32, i32) {
    %c0_i32 = arith.constant 0 : i32
    %c0_i32_0 = arith.constant 0 : i32
    return %arg0, %c0_i32 : i32, i32
  }
  func.func @transform_1(%arg0: i32) -> (i32, i32) {
    %c0_i32 = arith.constant 0 : i32
    %c0_i32_0 = arith.constant 0 : i32
    %c0_i32_1 = arith.constant 0 : i32
    return %c0_i32, %c0_i32_0 : i32, i32
  }
  func.func @transform_2(%arg0: i32) -> (i32, i32) {
    %c0_i32 = arith.constant 0 : i32
    %c0_i32_0 = arith.constant 0 : i32
    %c0_i32_1 = arith.constant 0 : i32
    return %c0_i32, %c0_i32_0 : i32, i32
  }
  func.func @transform_3(%arg0: i32) -> (i32, i32) {
    %c0_i32 = arith.constant 0 : i32
    %c0_i32_0 = arith.constant 0 : i32
    return %arg0, %c0_i32 : i32, i32
  }
}

</mosaic_0001>

<bundles_post_ra>
// kernel: tpu_custom_call.1
= control target key start
LH: loop header
LB: loop body
LE: loop exit
PB: predicated region body
PF: predicated region fallthrough
CT: control target
= control target key end

     0   :  { %vm59_vm0 = vcmask 261120   ;;  %s922_s1 = inlined_call_operand.vmem [shape: f32[32,32], index: 1, kind: input, shape index: {}]   ;;  %s923_s0 = inlined_call_operand.vmem [shape: f32[272,32], index: 0, kind: input, shape index: {}]   ;;  %s924_s2 = inlined_call_operand.vmem [shape: f32[1,32], index: 2, kind: input, shape index: {}]   ;;  %s925_s3 = inlined_call_operand.vmem [shape: f32[272,32], index: 3, kind: output, shape index: {}]  }
   0x1   :  { %v48_v0 = vld [vmem:[%s922_s1] sm:$0xff]  ;;  %v49_v1 = vld [vmem:[%s922_s1 + $0x8] sm:$0xff]  ;;  %v50_v2 = vld [vmem:[%s922_s1 + $0x10] sm:$0xff] }
   0x2   :  { %v567_v3 = vpack.c.bf16 %v49_v1, %v48_v0  ;;  %v51_v4 = vld [vmem:[%s922_s1 + $0x18] sm:$0xff]  ;;  %v14_v5 = vld [vmem:[%s923_s0] sm:$0xff]  ;;  %v32_v7 = vld [vmem:[%s923_s0 + $0x90] sm:$0xff] }
   0x3   :  { %v571_v6 = vpack.c.bf16 %v51_v4, %v50_v2  ;;  %516 = vmatprep.mubr.msk.f32.mxu0 %vm59_vm0, %v14_v5  ;;  %543 = vmatprep.mubr.msk.f32.mxu1 %vm59_vm0, %v32_v7  ;;  %v15_v8 = vld [vmem:[%s923_s0 + $0x8] sm:$0xff]  ;;  %v33_v9 = vld [vmem:[%s923_s0 + $0x98] sm:$0xff]  ;;  %v16_v10 = vld [vmem:[%s923_s0 + $0x10] sm:$0xff] }
   0x4   :  { %568 = vmatprep.subr.bf16.mxu0 %v567_v3  ;;  %575 = vmatprep.subr.bf16.mxu1 %v567_v3  ;;  %v34_v11 = vld [vmem:[%s923_s0 + $0xa0] sm:$0xff]  ;;  %v17_v12 = vld [vmem:[%s923_s0 + $0x18] sm:$0xff]  ;;  %v35_v13 = vld [vmem:[%s923_s0 + $0xa8] sm:$0xff] }
   0x5   :  { %570 = vmatpush3.bf16.msra.mxu0 %v567_v3  ;;  %577 = vmatpush3.bf16.msra.mxu1 %v567_v3  ;;  %v18_v14 = vld [vmem:[%s923_s0 + $0x20] sm:$0xff]  ;;  %v36_v15 = vld [vmem:[%s923_s0 + $0xb0] sm:$0xff]  ;;  %v19_v16 = vld [vmem:[%s923_s0 + $0x28] sm:$0xff] }
   0x6   :  { %572 = vmatprep.subr.bf16.mxu0 %v571_v6  ;;  %576 = vmatprep.subr.bf16.mxu1 %v571_v6  ;;  %v37_v17 = vld [vmem:[%s923_s0 + $0xb8] sm:$0xff]  ;;  %v20_v18 = vld [vmem:[%s923_s0 + $0x30] sm:$0xff]  ;;  %v38_v19 = vld [vmem:[%s923_s0 + $0xc0] sm:$0xff] }
   0x7   :  { %v21_v20 = vld [vmem:[%s923_s0 + $0x38] sm:$0xff]  ;;  %v39_v21 = vld [vmem:[%s923_s0 + $0xc8] sm:$0xff]  ;;  %v22_v22 = vld [vmem:[%s923_s0 + $0x40] sm:$0xff] }
   0x8   :  { %v40_v23 = vld [vmem:[%s923_s0 + $0xd0] sm:$0xff]  ;;  %v23_v24 = vld [vmem:[%s923_s0 + $0x48] sm:$0xff]  ;;  %v41_v25 = vld [vmem:[%s923_s0 + $0xd8] sm:$0xff] }
   0x9   :  { %574 = vmatpush3.bf16.msra.mxu0 %v571_v6  ;;  %578 = vmatpush3.bf16.msra.mxu1 %v571_v6  ;;  %v24_v26 = vld [vmem:[%s923_s0 + $0x50] sm:$0xff]  ;;  %v42_v27 = vld [vmem:[%s923_s0 + $0xe0] sm:$0xff]  ;;  %v25_v28 = vld [vmem:[%s923_s0 + $0x58] sm:$0xff] }
   0xa   :  { %v43_v29 = vld [vmem:[%s923_s0 + $0xe8] sm:$0xff]  ;;  %v26_v30 = vld [vmem:[%s923_s0 + $0x60] sm:$0xff]  ;;  %v44_v31 = vld [vmem:[%s923_s0 + $0xf0] sm:$0xff] }
   0xb   :  { %v27_v32 = vld [vmem:[%s923_s0 + $0x68] sm:$0xff]  ;;  %v45_v33 = vld [vmem:[%s923_s0 + $0xf8] sm:$0xff]  ;;  %v28_v34 = vld [vmem:[%s923_s0 + $0x70] sm:$0xff] }
   0xc   :  { %517 = vmatmul.mubr.msk.f32.vlgmr.msra.gmra.mrb[0].mxu0 %vm59_vm0, %v15_v8  ;;  %544 = vmatmul.mubr.msk.f32.vlgmr.msra.gmra.mrb[0].mxu1 %vm59_vm0, %v33_v9  ;;  %v46_v35 = vld [vmem:[%s923_s0 + $0x100] sm:$0xff]  ;;  %v29_v36 = vld [vmem:[%s923_s0 + $0x78] sm:$0xff]  ;;  %v47_v37 = vld [vmem:[%s923_s0 + $0x108] sm:$0xff] }
   0xd   :  { %519 = vmatprep.mubr.msk.f32.mxu0 %vm59_vm0, %v16_v10  ;;  %546 = vmatprep.mubr.msk.f32.mxu1 %vm59_vm0, %v34_v11  ;;  %v30_v38 = vld [vmem:[%s923_s0 + $0x80] sm:$0xff]  ;;  %v31_v39 = vld [vmem:[%s923_s0 + $0x88] sm:$0xff] }
   0xe   :  { %v750_v40 = vld [vmem:[%s924_s2] ss:$0 sm:$0xff] }
  0x10   :  { %520 = vmatmul.mubr.msk.f32.gmra.mrb[2].mxu0 %vm59_vm0, %v17_v12  ;;  %547 = vmatmul.mubr.msk.f32.gmra.mrb[2].mxu1 %vm59_vm0, %v35_v13 }
  0x11   :  { %522 = vmatprep.mubr.msk.f32.mxu0 %vm59_vm0, %v18_v14  ;;  %549 = vmatprep.mubr.msk.f32.mxu1 %vm59_vm0, %v36_v15 }
  0x14   :  { %523 = vmatmul.mubr.msk.f32.gmra.mrb[4].mxu0 %vm59_vm0, %v19_v16  ;;  %550 = vmatmul.mubr.msk.f32.gmra.mrb[4].mxu1 %vm59_vm0, %v37_v17 }
  0x15   :  { %525 = vmatprep.mubr.msk.f32.mxu0 %vm59_vm0, %v20_v18  ;;  %552 = vmatprep.mubr.msk.f32.mxu1 %vm59_vm0, %v38_v19 }
  0x18   :  { %526 = vmatmul.mubr.msk.f32.gmra.mrb[6].mxu0 %vm59_vm0, %v21_v20  ;;  %553 = vmatmul.mubr.msk.f32.gmra.mrb[6].mxu1 %vm59_vm0, %v39_v21 }
  0x19   :  { %528 = vmatprep.mubr.msk.f32.mxu0 %vm59_vm0, %v22_v22  ;;  %555 = vmatprep.mubr.msk.f32.mxu1 %vm59_vm0, %v40_v23 }
  0x1c   :  { %529 = vmatmul.mubr.msk.f32.gmra.mrb[8].mxu0 %vm59_vm0, %v23_v24  ;;  %556 = vmatmul.mubr.msk.f32.gmra.mrb[8].mxu1 %vm59_vm0, %v41_v25 }
  0x1d   :  { %531 = vmatprep.mubr.msk.f32.mxu0 %vm59_vm0, %v24_v26  ;;  %558 = vmatprep.mubr.msk.f32.mxu1 %vm59_vm0, %v42_v27 }
  0x20   :  { %532 = vmatmul.mubr.msk.f32.gmra.mrb[10].mxu0 %vm59_vm0, %v25_v28  ;;  %559 = vmatmul.mubr.msk.f32.gmra.mrb[10].mxu1 %vm59_vm0, %v43_v29 }
  0x21   :  { %534 = vmatprep.mubr.msk.f32.mxu0 %vm59_vm0, %v26_v30  ;;  %561 = vmatprep.mubr.msk.f32.mxu1 %vm59_vm0, %v44_v31 }
  0x24   :  { %535 = vmatmul.mubr.msk.f32.gmra.mrb[12].mxu0 %vm59_vm0, %v27_v32  ;;  %562 = vmatmul.mubr.msk.f32.gmra.mrb[12].mxu1 %vm59_vm0, %v45_v33 }
  0x25   :  { %537 = vmatprep.mubr.msk.f32.mxu0 %vm59_vm0, %v28_v34  ;;  %564 = vmatprep.mubr.msk.f32.mxu1 %vm59_vm0, %v46_v35 }
  0x28   :  { %538 = vmatmul.mubr.msk.f32.gmra.mrb[14].mxu0 %vm59_vm0, %v29_v36  ;;  %565 = vmatmul.mubr.msk.f32.gmra.mrb[14].mxu1 %vm59_vm0, %v47_v37 }
  0x29   :  { %540 = vmatprep.mubr.msk.f32.mxu0 %vm59_vm0, %v30_v38 }
  0x2c   :  { %541 = vmatmul.mubr.msk.f32.gmra.mrb[16].mxu0 %vm59_vm0, %v31_v39 }
  0xdf   :  { %v518_v41 = vpop.f32.mrb[0].mxu0  ;;  %v545_v42 = vpop.f32.mrb[0].mxu1 }
  0xe0   :  { %v234_v43 = vadd.f32 %v518_v41, %v750_v40  ;;  %v228_v44 = vpop.f32.mrb[1].mxu0  ;;  %v324_v45 = vadd.f32 %v545_v42, %v750_v40  ;;  %v318_v46 = vpop.f32.mrb[1].mxu1 }
  0xe1   :  { %v229_v47 = vadd.f32 %v750_v40, %v228_v44  ;;  %v319_v48 = vadd.f32 %v750_v40, %v318_v46 }
  0xe2   :  { %398 = vst.msk [vmem:[%s925_s3 + $0x8] sm:$0xff] %vm59_vm0, %v234_v43  ;;  %416 = vst.msk [vmem:[%s925_s3 + $0x98] sm:$0xff] %vm59_vm0, %v324_v45 }
  0xe3   :  { %397 = vst.msk [vmem:[%s925_s3] sm:$0xff] %vm59_vm0, %v229_v47  ;;  %v521_v49 = vpop.f32.mrb[2].mxu0  ;;  %415 = vst.msk [vmem:[%s925_s3 + $0x90] sm:$0xff] %vm59_vm0, %v319_v48  ;;  %v548_v50 = vpop.f32.mrb[2].mxu1 }
  0xe4   :  { %v244_v51 = vadd.f32 %v521_v49, %v750_v40  ;;  %v238_v52 = vpop.f32.mrb[3].mxu0  ;;  %v334_v53 = vadd.f32 %v548_v50, %v750_v40  ;;  %v328_v54 = vpop.f32.mrb[3].mxu1 }
  0xe5   :  { %v239_v55 = vadd.f32 %v750_v40, %v238_v52  ;;  %v329_v56 = vadd.f32 %v750_v40, %v328_v54 }
  0xe6   :  { %400 = vst.msk [vmem:[%s925_s3 + $0x18] sm:$0xff] %vm59_vm0, %v244_v51  ;;  %418 = vst.msk [vmem:[%s925_s3 + $0xa8] sm:$0xff] %vm59_vm0, %v334_v53 }
  0xe7   :  { %399 = vst.msk [vmem:[%s925_s3 + $0x10] sm:$0xff] %vm59_vm0, %v239_v55  ;;  %v524_v57 = vpop.f32.mrb[4].mxu0  ;;  %417 = vst.msk [vmem:[%s925_s3 + $0xa0] sm:$0xff] %vm59_vm0, %v329_v56  ;;  %v551_v58 = vpop.f32.mrb[4].mxu1 }
  0xe8   :  { %v254_v59 = vadd.f32 %v524_v57, %v750_v40  ;;  %v248_v60 = vpop.f32.mrb[5].mxu0  ;;  %v344_v61 = vadd.f32 %v551_v58, %v750_v40  ;;  %v338_v62 = vpop.f32.mrb[5].mxu1 }
  0xe9   :  { %v249_v63 = vadd.f32 %v750_v40, %v248_v60  ;;  %v339_v0 = vadd.f32 %v750_v40, %v338_v62 }
  0xea   :  { %402 = vst.msk [vmem:[%s925_s3 + $0x28] sm:$0xff] %vm59_vm0, %v254_v59  ;;  %420 = vst.msk [vmem:[%s925_s3 + $0xb8] sm:$0xff] %vm59_vm0, %v344_v61 }
  0xeb   :  { %401 = vst.msk [vmem:[%s925_s3 + $0x20] sm:$0xff] %vm59_vm0, %v249_v63  ;;  %v527_v1 = vpop.f32.mrb[6].mxu0  ;;  %419 = vst.msk [vmem:[%s925_s3 + $0xb0] sm:$0xff] %vm59_vm0, %v339_v0  ;;  %v554_v2 = vpop.f32.mrb[6].mxu1 }
  0xec   :  { %v264_v3 = vadd.f32 %v527_v1, %v750_v40  ;;  %v258_v4 = vpop.f32.mrb[7].mxu0  ;;  %v354_v5 = vadd.f32 %v554_v2, %v750_v40  ;;  %v348_v6 = vpop.f32.mrb[7].mxu1 }
  0xed   :  { %v259_v7 = vadd.f32 %v750_v40, %v258_v4  ;;  %v349_v8 = vadd.f32 %v750_v40, %v348_v6 }
  0xee   :  { %404 = vst.msk [vmem:[%s925_s3 + $0x38] sm:$0xff] %vm59_vm0, %v264_v3  ;;  %422 = vst.msk [vmem:[%s925_s3 + $0xc8] sm:$0xff] %vm59_vm0, %v354_v5 }
  0xef   :  { %403 = vst.msk [vmem:[%s925_s3 + $0x30] sm:$0xff] %vm59_vm0, %v259_v7  ;;  %v530_v9 = vpop.f32.mrb[8].mxu0  ;;  %421 = vst.msk [vmem:[%s925_s3 + $0xc0] sm:$0xff] %vm59_vm0, %v349_v8  ;;  %v557_v10 = vpop.f32.mrb[8].mxu1 }
  0xf0   :  { %v274_v11 = vadd.f32 %v530_v9, %v750_v40  ;;  %v268_v12 = vpop.f32.mrb[9].mxu0  ;;  %v364_v13 = vadd.f32 %v557_v10, %v750_v40  ;;  %v358_v14 = vpop.f32.mrb[9].mxu1 }
  0xf1   :  { %v269_v15 = vadd.f32 %v750_v40, %v268_v12  ;;  %v359_v16 = vadd.f32 %v750_v40, %v358_v14 }
  0xf2   :  { %406 = vst.msk [vmem:[%s925_s3 + $0x48] sm:$0xff] %vm59_vm0, %v274_v11  ;;  %424 = vst.msk [vmem:[%s925_s3 + $0xd8] sm:$0xff] %vm59_vm0, %v364_v13 }
  0xf3   :  { %405 = vst.msk [vmem:[%s925_s3 + $0x40] sm:$0xff] %vm59_vm0, %v269_v15  ;;  %v533_v17 = vpop.f32.mrb[10].mxu0  ;;  %423 = vst.msk [vmem:[%s925_s3 + $0xd0] sm:$0xff] %vm59_vm0, %v359_v16  ;;  %v560_v18 = vpop.f32.mrb[10].mxu1 }
  0xf4   :  { %v284_v19 = vadd.f32 %v533_v17, %v750_v40  ;;  %v278_v20 = vpop.f32.mrb[11].mxu0  ;;  %v374_v21 = vadd.f32 %v560_v18, %v750_v40  ;;  %v368_v22 = vpop.f32.mrb[11].mxu1 }
  0xf5   :  { %v279_v23 = vadd.f32 %v750_v40, %v278_v20  ;;  %v369_v24 = vadd.f32 %v750_v40, %v368_v22 }
  0xf6   :  { %408 = vst.msk [vmem:[%s925_s3 + $0x58] sm:$0xff] %vm59_vm0, %v284_v19  ;;  %426 = vst.msk [vmem:[%s925_s3 + $0xe8] sm:$0xff] %vm59_vm0, %v374_v21 }
  0xf7   :  { %407 = vst.msk [vmem:[%s925_s3 + $0x50] sm:$0xff] %vm59_vm0, %v279_v23  ;;  %v536_v25 = vpop.f32.mrb[12].mxu0  ;;  %425 = vst.msk [vmem:[%s925_s3 + $0xe0] sm:$0xff] %vm59_vm0, %v369_v24  ;;  %v563_v26 = vpop.f32.mrb[12].mxu1 }
  0xf8   :  { %v294_v27 = vadd.f32 %v536_v25, %v750_v40  ;;  %v288_v28 = vpop.f32.mrb[13].mxu0  ;;  %v384_v29 = vadd.f32 %v563_v26, %v750_v40  ;;  %v378_v30 = vpop.f32.mrb[13].mxu1 }
  0xf9   :  { %v289_v31 = vadd.f32 %v750_v40, %v288_v28  ;;  %v379_v32 = vadd.f32 %v750_v40, %v378_v30 }
  0xfa   :  { %410 = vst.msk [vmem:[%s925_s3 + $0x68] sm:$0xff] %vm59_vm0, %v294_v27  ;;  %428 = vst.msk [vmem:[%s925_s3 + $0xf8] sm:$0xff] %vm59_vm0, %v384_v29 }
  0xfb   :  { %409 = vst.msk [vmem:[%s925_s3 + $0x60] sm:$0xff] %vm59_vm0, %v289_v31  ;;  %v539_v33 = vpop.f32.mrb[14].mxu0  ;;  %427 = vst.msk [vmem:[%s925_s3 + $0xf0] sm:$0xff] %vm59_vm0, %v379_v32  ;;  %v566_v34 = vpop.f32.mrb[14].mxu1 }
  0xfc   :  { %v304_v35 = vadd.f32 %v539_v33, %v750_v40  ;;  %v298_v36 = vpop.f32.mrb[15].mxu0  ;;  %v394_v37 = vadd.f32 %v566_v34, %v750_v40  ;;  %v388_v38 = vpop.f32.mrb[15].mxu1 }
  0xfd   :  { %v299_v39 = vadd.f32 %v750_v40, %v298_v36  ;;  %v389_v41 = vadd.f32 %v750_v40, %v388_v38 }
  0xfe   :  { %412 = vst.msk [vmem:[%s925_s3 + $0x78] sm:$0xff] %vm59_vm0, %v304_v35  ;;  %430 = vst.msk [vmem:[%s925_s3 + $0x108] sm:$0xff] %vm59_vm0, %v394_v37 }
  0xff   :  { %411 = vst.msk [vmem:[%s925_s3 + $0x70] sm:$0xff] %vm59_vm0, %v299_v39  ;;  %v542_v42 = vpop.f32.mrb[16].mxu0  ;;  %429 = vst.msk [vmem:[%s925_s3 + $0x100] sm:$0xff] %vm59_vm0, %v389_v41 }
 0x100   :  { %v314_v43 = vadd.f32 %v542_v42, %v750_v40  ;;  %v308_v44 = vpop.f32.mrb[17].mxu0 }
 0x101   :  { %v309_v45 = vadd.f32 %v750_v40, %v308_v44 }
 0x102   :  { %414 = vst.msk [vmem:[%s925_s3 + $0x88] sm:$0xff] %vm59_vm0, %v314_v43 }
 0x103   :  { %413 = vst.msk [vmem:[%s925_s3 + $0x80] sm:$0xff] %vm59_vm0, %v309_v45 }

</bundles_post_ra>
